<compile_context>
chip_gen: v7x
topology: tpu7x:2x2x1
jax: 0.10.0
libtpu: 0.0.40
codegen_flags: <defaults>
</compile_context>

<pallas_src>
import functools

import jax
import jax.numpy as jnp
from jax.experimental import pallas as pl
from jax.experimental.pallas import tpu as pltpu


# -----------------------------------------------------------------------------
# Fused fcNet kernel: fc1 + bias + ReLU + dropout(identity, eval) + log_softmax
# -----------------------------------------------------------------------------
def _fcnet_kernel(x_ref, w1_ref, b1_ref, o_ref):
    # x_ref: (bn, 784)  w1_ref: (784, 20)  b1_ref: (1, 20)  o_ref: (bn, 20)
    h = jnp.dot(x_ref[...], w1_ref[...], preferred_element_type=jnp.float32)
    h = h + b1_ref[...]
    h = jnp.maximum(h, 0.0)                       # ReLU
    # Dropout(p=0.5): inference-mode identity.
    # TODO(synk): training-mode dropout (random mask + 1/(1-p) scale) not implemented.
    # Second F.relu in the PyTorch forward is idempotent after ReLU -> folded away.
    m = jnp.max(h, axis=-1, keepdims=True)        # log_softmax(dim=1), row-local
    s = h - m
    lse = jnp.log(jnp.sum(jnp.exp(s), axis=-1, keepdims=True))
    o_ref[...] = s - lse


def _round_up(x, m):
    return ((x + m - 1) // m) * m


def _choose_block(n, block_n):
    """Pick the batch-chunk size (rows per grid step)."""
    # Clamp: multiple of 8 rows, and <= 4096 so the double-buffered input block
    # (~2 * bn * 784 * 4 B) stays well under scoped VMEM on v5e/v6e/v7x.
    block_n = max(8, min(_round_up(block_n, 8), 4096))
    if n <= block_n:
        if n < 64:
            # Tiny batch: one block equal to the full array dims (legal even
            # when n is not a multiple of 8 -- block == array shape).
            return n
        # Ensure >= 2 "parallel" grid steps so a v7x megacore uses both
        # TensorCores (harmless single-TC on v5e/v6e).
        return _round_up(pl.cdiv(n, 2), 8)
    return block_n


# -----------------------------------------------------------------------------
# Wrapper
# -----------------------------------------------------------------------------
@functools.partial(jax.jit, static_argnames=("block_n",))
def fcnet_forward(x_nchw, w1, b1, *, block_n=512):
    """x_nchw: (N, 1, 28, 28). w1: (784, 20), b1: (1, 20). Returns (N, 20) log-probs."""
    N = x_nchw.shape[0]
    x_flat = x_nchw.reshape(N, -1)               # torch.flatten(x, start_dim=1) -> (N, 784)
    D = x_flat.shape[1]
    H = w1.shape[1]

    bn = _choose_block(N, block_n)
    n_blocks = pl.cdiv(N, bn)                    # partial last block handled by Pallas masking

    # Conservative VMEM budget: double-buffered input/output blocks + resident
    # weight/bias, plus headroom.  Capped at 48 MiB (< v7x's 64 MiB physical).
    x_bytes = x_flat.dtype.itemsize
    w_bytes = w1.dtype.itemsize
    needed = (2 * bn * D * x_bytes            # input block, double-buffered
              + 2 * bn * H * 4                # output block, double-buffered
              + 2 * (D * H * w_bytes + H * 4))  # weight + bias buffers
    vmem_limit = int(min(48 * 1024 * 1024,
                         max(16 * 1024 * 1024, needed + 4 * 1024 * 1024)))

    cost = pl.CostEstimate(
        flops=2 * N * D * H,
        transcendentals=N * H,
        bytes_accessed=N * D * x_bytes + D * H * w_bytes + N * H * 4,
    )

    return pl.pallas_call(
        _fcnet_kernel,
        out_shape=jax.ShapeDtypeStruct((N, H), jnp.float32),
        grid=(n_blocks,),
        in_specs=[
            pl.BlockSpec((bn, D), lambda i: (i, 0)),   # activations: batch-chunked stream
            pl.BlockSpec((D, H), lambda i: (0, 0)),    # fc1 weight: VMEM-resident
            pl.BlockSpec((1, H), lambda i: (0, 0)),    # fc1 bias: VMEM-resident
        ],
        out_specs=pl.BlockSpec((bn, H), lambda i: (i, 0)),
        compiler_params=pltpu.CompilerParams(
            dimension_semantics=("parallel",),
            vmem_limit_bytes=vmem_limit,
        ),
        cost_estimate=cost,
    )(x_flat, w1, b1)


# -----------------------------------------------------------------------------
# Parameters (deterministic, PyTorch nn.Linear-shaped) & pure-JAX reference
# -----------------------------------------------------------------------------
def init_params(key):
    k1, k2, k3, k4 = jax.random.split(key, 4)

    def u(k, shape, fan_in):
        bound = 1.0 / float(fan_in) ** 0.5
        return jax.random.uniform(k, shape, jnp.float32, -bound, bound)

    return {
        "fc1_w": u(k1, (20, 784), 784),   # nn.Linear(784, 20): weight is (out, in)
        "fc1_b": u(k2, (20,), 784),
        # fc2 exists in the module's __init__ but is unused by forward():
        "fc2_w": u(k3, (10, 20), 20),
        "fc2_b": u(k4, (10,), 20),
    }


def prepare_params(params):
    """One-time param prep outside the hot path: pre-transposed weight + 2-D bias."""
    w1 = jnp.asarray(params["fc1_w"]).T.copy()          # (784, 20)
    b1 = jnp.asarray(params["fc1_b"]).reshape(1, -1)    # (1, 20)
    return w1, b1


def reference_forward(x_nchw, p):
    xf = x_nchw.reshape(x_nchw.shape[0], -1)
    h = xf @ p["fc1_w"].T + p["fc1_b"]
    h = jax.nn.relu(h)
    # Dropout: inference-mode identity; second ReLU is idempotent.
    h = jax.nn.relu(h)
    return jax.nn.log_softmax(h, axis=-1)


if __name__ == "__main__":
    params = init_params(jax.random.PRNGKey(0))
    w1, b1 = prepare_params(params)

    # Small MNIST-shaped batch (the module's forward implies (N, 1, 28, 28)).
    x = jax.random.normal(jax.random.PRNGKey(0), (2, 1, 28, 28), jnp.float32)
    out = jax.block_until_ready(fcnet_forward(x, w1, b1))
    assert out.shape == (2, 20) and out.dtype == jnp.float32
    ref = reference_forward(x, params)
    if not bool(jnp.allclose(out, ref, atol=1e-4, rtol=1e-4)):
        raise AssertionError(
            "Pallas/reference mismatch (small batch), max abs diff = "
            f"{float(jnp.max(jnp.abs(out - ref)))}")

    # Also exercise the multi-block + partial-last-block (no-padding) path.
    x2 = jax.random.normal(jax.random.PRNGKey(1), (100, 1, 28, 28), jnp.float32)
    out2 = jax.block_until_ready(fcnet_forward(x2, w1, b1))
    ref2 = reference_forward(x2, params)
    if not bool(jnp.allclose(out2, ref2, atol=1e-4, rtol=1e-4)):
        raise AssertionError(
            "Pallas/reference mismatch (partial block), max abs diff = "
            f"{float(jnp.max(jnp.abs(out2 - ref2)))}")

    print("KERNEL_OK")
</pallas_src>

<mosaic_0001>
module attributes {stable_mosaic.version = 11 : i64} {
  func.func @_fcnet_kernel(%arg0: i32, %arg1: memref<2x784xf32, #tpu.memory_space<vmem>>, %arg2: memref<784x20xf32, #tpu.memory_space<vmem>>, %arg3: memref<1x20xf32, #tpu.memory_space<vmem>>, %arg4: memref<2x20xf32, #tpu.memory_space<vmem>>) attributes {dimension_semantics = [#tpu.dimension_semantics<parallel>], iteration_bounds = array<i64: 1>, scalar_prefetch = 0 : i64, scratch_operands = 0 : i64, tpu.core_type = #tpu.core_type<tc>, window_params = [{transform_indices = @transform_0, window_bounds = array<i64: 2, 784>}, {pipeline_mode = #tpu.pipeline_mode<synchronous>, transform_indices = @transform_1, window_bounds = array<i64: 784, 20>}, {pipeline_mode = #tpu.pipeline_mode<synchronous>, transform_indices = @transform_2, window_bounds = array<i64: 1, 20>}, {transform_indices = @transform_3, window_bounds = array<i64: 2, 20>}]} {
    %c0 = arith.constant 0 : index
    %c0_0 = arith.constant 0 : index
    %0 = vector.load %arg1[%c0, %c0_0] : memref<2x784xf32, #tpu.memory_space<vmem>>, vector<2x784xf32>
    %c0_1 = arith.constant 0 : index
    %c0_2 = arith.constant 0 : index
    %1 = vector.load %arg2[%c0_1, %c0_2] : memref<784x20xf32, #tpu.memory_space<vmem>>, vector<784x20xf32>
    %cst = arith.constant dense<0.000000e+00> : vector<2x20xf32>
    %2 = tpu.matmul %0, %1, %cst {dimension_numbers = #tpu.dot_dimension_numbers<[1], [0], [0], [1], [0, 0, 1, 1], [], []>} : vector<2x784xf32>, vector<784x20xf32>, vector<2x20xf32> -> vector<2x20xf32>
    %c0_3 = arith.constant 0 : index
    %c0_4 = arith.constant 0 : index
    %3 = vector.load %arg3[%c0_3, %c0_4] : memref<1x20xf32, #tpu.memory_space<vmem>>, vector<1x20xf32>
    %4 = vector.broadcast %3 : vector<1x20xf32> to vector<2x20xf32>
    %5 = arith.addf %2, %4 : vector<2x20xf32>
    %cst_5 = arith.constant 0.000000e+00 : f32
    %6 = vector.broadcast %cst_5 : f32 to vector<2x20xf32>
    %7 = arith.maximumf %5, %6 : vector<2x20xf32>
    %cst_6 = arith.constant dense<0xFF800000> : vector<2xf32>
    %8 = vector.multi_reduction <maximumf>, %7, %cst_6 [1] : vector<2x20xf32> to vector<2xf32>
    %9 = vector.shape_cast %8 : vector<2xf32> to vector<2x1xf32>
    %10 = vector.broadcast %9 : vector<2x1xf32> to vector<2x20xf32>
    %11 = arith.subf %7, %10 : vector<2x20xf32>
    %12 = math.exp %11 : vector<2x20xf32>
    %cst_7 = arith.constant dense<0.000000e+00> : vector<2xf32>
    %13 = vector.multi_reduction <add>, %12, %cst_7 [1] : vector<2x20xf32> to vector<2xf32>
    %14 = vector.shape_cast %13 : vector<2xf32> to vector<2x1xf32>
    %15 = math.log %14 : vector<2x1xf32>
    %16 = vector.broadcast %15 : vector<2x1xf32> to vector<2x20xf32>
    %17 = arith.subf %11, %16 : vector<2x20xf32>
    %c0_8 = arith.constant 0 : index
    %c0_9 = arith.constant 0 : index
    %18 = vector.load %arg4[%c0_8, %c0_9] : memref<2x20xf32, #tpu.memory_space<vmem>>, vector<2x20xf32>
    tpu.vector_store %arg4[%c0_8, %c0_9], %17 {strides = array<i32>} : memref<2x20xf32, #tpu.memory_space<vmem>>, vector<2x20xf32>,
    return
  }
  func.func @transform_0(%arg0: i32) -> (i32, i32) {
    %c0_i32 = arith.constant 0 : i32
    %c0_i32_0 = arith.constant 0 : i32
    return %arg0, %c0_i32 : i32, i32
  }
  func.func @transform_1(%arg0: i32) -> (i32, i32) {
    %c0_i32 = arith.constant 0 : i32
    %c0_i32_0 = arith.constant 0 : i32
    %c0_i32_1 = arith.constant 0 : i32
    return %c0_i32, %c0_i32_0 : i32, i32
  }
  func.func @transform_2(%arg0: i32) -> (i32, i32) {
    %c0_i32 = arith.constant 0 : i32
    %c0_i32_0 = arith.constant 0 : i32
    %c0_i32_1 = arith.constant 0 : i32
    return %c0_i32, %c0_i32_0 : i32, i32
  }
  func.func @transform_3(%arg0: i32) -> (i32, i32) {
    %c0_i32 = arith.constant 0 : i32
    %c0_i32_0 = arith.constant 0 : i32
    return %arg0, %c0_i32 : i32, i32
  }
}

</mosaic_0001>

<bundles_post_ra>
// kernel: fcnet_forward.1
= control target key start
LH: loop header
LB: loop body
LE: loop exit
PB: predicated region body
PF: predicated region fallthrough
CT: control target
= control target key end

     0   :  { %v726_v43 = vmov 1983009808   ;;  %v128_v45 = vlaneseq  ;;  %s1080_s0 = inlined_call_operand.vmem [shape: f32[2,784], index: 0, kind: input, shape index: {}]   ;;  %s1081_s1 = inlined_call_operand.vmem [shape: f32[784,20], index: 1, kind: input, shape index: {}]   ;;  %s1082_s2 = inlined_call_operand.vmem [shape: f32[1,20], index: 2, kind: input, shape index: {}]   ;;  %s1083_s3 = inlined_call_operand.hbm [shape: f32[2,20], index: 3, kind: output, shape index: {}]  }
   0x1   :  { %v33_v0 = vld [vmem:[%s1081_s1 + $0x80] sm:$0xff]  ;;  %v34_v1 = vld [vmem:[%s1081_s1 + $0x88] sm:$0xff]  ;;  %v35_v11 = vld [vmem:[%s1081_s1 + $0x90] sm:$0xff]  ;;  %v126_v44 = vunpack.c.l.s4 %v726_v43 }
   0x2   :  { %v17_v2 = vld [vmem:[%s1081_s1] sm:$0xff]  ;;  %v592_v3 = vpack.c.bf16 %v34_v1, %v33_v0  ;;  %v18_v4 = vld [vmem:[%s1081_s1 + $0x8] sm:$0xff]  ;;  %v36_v13 = vld [vmem:[%s1081_s1 + $0x98] sm:$0xff]  ;;  %v129_v60 = vshrl.u32 %v128_v45, 7 }
   0x3   :  { %v65_v5 = vld [vmem:[%s1081_s1 + $0x180] sm:$0xff]  ;;  %v66_v6 = vld [vmem:[%s1081_s1 + $0x188] sm:$0xff]  ;;  %v594_v7 = vpack.c.bf16 %v18_v4, %v17_v2  ;;  %v19_v14 = vld [vmem:[%s1081_s1 + $0x10] sm:$0xff]  ;;  %v596_v16 = vpack.c.bf16 %v36_v13, %v35_v11  ;;  %v127_v59 = vunpack.c.0.s8 %v126_v44 }
   0x4   :  { %v624_v8 = vpack.c.bf16 %v66_v6, %v65_v5  ;;  %v49_v9 = vld [vmem:[%s1081_s1 + $0x100] sm:$0xff]  ;;  %v50_v10 = vld [vmem:[%s1081_s1 + $0x108] sm:$0xff]  ;;  %593 = vmatprep.subr.bf16.mxu0 %v592_v3  ;;  %v20_v15 = vld [vmem:[%s1081_s1 + $0x18] sm:$0xff] }
   0x5   :  { %v626_v12 = vpack.c.bf16 %v50_v10, %v49_v9  ;;  %595 = vmatpush3.bf16.msra.mxu0 %v594_v7  ;;  %v598_v17 = vpack.c.bf16 %v20_v15, %v19_v14  ;;  %v67_v18 = vld [vmem:[%s1081_s1 + $0x190] sm:$0xff]  ;;  %v68_v19 = vld [vmem:[%s1081_s1 + $0x198] sm:$0xff]  ;;  %v37_v23 = vld [vmem:[%s1081_s1 + $0xa0] sm:$0xff]  ;;  %v895_v10 = vsub.s32 %v127_v59, %v129_v60 }
   0x6   :  { %625 = vmatprep.subr.bf16.mxu1 %v624_v8  ;;  %v51_v20 = vld [vmem:[%s1081_s1 + $0x110] sm:$0xff]  ;;  %v628_v21 = vpack.c.bf16 %v68_v19, %v67_v18  ;;  %v52_v22 = vld [vmem:[%s1081_s1 + $0x118] sm:$0xff]  ;;  %v38_v24 = vld [vmem:[%s1081_s1 + $0xa8] sm:$0xff]  ;;  %597 = vmatprep.subr.bf16.mxu0 %v596_v16 }
   0x7   :  { %627 = vmatpush3.bf16.msra.mxu1 %v626_v12  ;;  %v630_v25 = vpack.c.bf16 %v52_v22, %v51_v20  ;;  %v600_v26 = vpack.c.bf16 %v38_v24, %v37_v23  ;;  %v21_v27 = vld [vmem:[%s1081_s1 + $0x20] sm:$0xff]  ;;  %v22_v28 = vld [vmem:[%s1081_s1 + $0x28] sm:$0xff]  ;;  %v39_v35 = vld [vmem:[%s1081_s1 + $0xb0] sm:$0xff] }
   0x8   :  { %v69_v29 = vld [vmem:[%s1081_s1 + $0x1a0] sm:$0xff]  ;;  %629 = vmatprep.subr.bf16.mxu1 %v628_v21  ;;  %v70_v30 = vld [vmem:[%s1081_s1 + $0x1a8] sm:$0xff]  ;;  %v602_v33 = vpack.c.bf16 %v22_v28, %v21_v27  ;;  %v40_v36 = vld [vmem:[%s1081_s1 + $0xb8] sm:$0xff] }
   0x9   :  { %v53_v31 = vld [vmem:[%s1081_s1 + $0x120] sm:$0xff]  ;;  %v54_v32 = vld [vmem:[%s1081_s1 + $0x128] sm:$0xff]  ;;  %599 = vmatpush3.bf16.msra.mxu0 %v598_v17  ;;  %v632_v34 = vpack.c.bf16 %v70_v30, %v69_v29  ;;  %v23_v37 = vld [vmem:[%s1081_s1 + $0x30] sm:$0xff]  ;;  %v604_v39 = vpack.c.bf16 %v40_v36, %v39_v35 }
   0xa   :  { %601 = vmatprep.subr.bf16.mxu0 %v600_v26  ;;  %v634_v38 = vpack.c.bf16 %v54_v32, %v53_v31  ;;  %v24_v40 = vld [vmem:[%s1081_s1 + $0x38] sm:$0xff]  ;;  %v71_v41 = vld [vmem:[%s1081_s1 + $0x1b0] sm:$0xff]  ;;  %v41_v49 = vld [vmem:[%s1081_s1 + $0xc0] sm:$0xff] }
   0xb   :  { %631 = vmatpush3.bf16.msra.mxu1 %v630_v25  ;;  %v72_v42 = vld [vmem:[%s1081_s1 + $0x1b8] sm:$0xff]  ;;  %v55_v47 = vld [vmem:[%s1081_s1 + $0x130] sm:$0xff]  ;;  %v42_v50 = vld [vmem:[%s1081_s1 + $0xc8] sm:$0xff]  ;;  %v606_v51 = vpack.c.bf16 %v24_v40, %v23_v37 }
   0xc   :  { %633 = vmatprep.subr.bf16.mxu1 %v632_v34  ;;  %v636_v46 = vpack.c.bf16 %v72_v42, %v71_v41  ;;  %v56_v48 = vld [vmem:[%s1081_s1 + $0x138] sm:$0xff]  ;;  %v73_v52 = vld [vmem:[%s1081_s1 + $0x1c0] sm:$0xff]  ;;  %v74_v53 = vld [vmem:[%s1081_s1 + $0x1c8] sm:$0xff]  ;;  %v608_v55 = vpack.c.bf16 %v42_v50, %v41_v49 }
   0xd   :  { %603 = vmatpush3.bf16.msra.mxu0 %v602_v33  ;;  %v638_v54 = vpack.c.bf16 %v56_v48, %v55_v47  ;;  %v25_v56 = vld [vmem:[%s1081_s1 + $0x40] sm:$0xff]  ;;  %v26_v57 = vld [vmem:[%s1081_s1 + $0x48] sm:$0xff]  ;;  %v640_v61 = vpack.c.bf16 %v74_v53, %v73_v52  ;;  %v43_v63 = vld [vmem:[%s1081_s1 + $0xd0] sm:$0xff] }
   0xe   :  { %605 = vmatprep.subr.bf16.mxu0 %v604_v39  ;;  %v57_v58 = vld [vmem:[%s1081_s1 + $0x140] sm:$0xff]  ;;  %v58_v62 = vld [vmem:[%s1081_s1 + $0x148] sm:$0xff]  ;;  %v44_v0 = vld [vmem:[%s1081_s1 + $0xd8] sm:$0xff]  ;;  %v610_v3 = vpack.c.bf16 %v26_v57, %v25_v56 }
   0xf   :  { %635 = vmatpush3.bf16.msra.mxu1 %v634_v38  ;;  %v75_v1 = vld [vmem:[%s1081_s1 + $0x1d0] sm:$0xff]  ;;  %v76_v2 = vld [vmem:[%s1081_s1 + $0x1d8] sm:$0xff]  ;;  %v642_v5 = vpack.c.bf16 %v58_v62, %v57_v58  ;;  %v612_v6 = vpack.c.bf16 %v44_v0, %v43_v63  ;;  %v45_v12 = vld [vmem:[%s1081_s1 + $0xe0] sm:$0xff] }
  0x10   :  { %637 = vmatprep.subr.bf16.mxu1 %v636_v46  ;;  %v27_v4 = vld [vmem:[%s1081_s1 + $0x50] sm:$0xff]  ;;  %v28_v7 = vld [vmem:[%s1081_s1 + $0x58] sm:$0xff]  ;;  %v644_v11 = vpack.c.bf16 %v76_v2, %v75_v1  ;;  %v46_v13 = vld [vmem:[%s1081_s1 + $0xe8] sm:$0xff] }
  0x11   :  { %607 = vmatpush3.bf16.msra.mxu0 %v606_v51  ;;  %v59_v8 = vld [vmem:[%s1081_s1 + $0x150] sm:$0xff]  ;;  %v60_v9 = vld [vmem:[%s1081_s1 + $0x158] sm:$0xff]  ;;  %v77_v14 = vld [vmem:[%s1081_s1 + $0x1e0] sm:$0xff]  ;;  %v614_v16 = vpack.c.bf16 %v28_v7, %v27_v4  ;;  %v616_v19 = vpack.c.bf16 %v46_v13, %v45_v12 }
  0x12   :  { %609 = vmatprep.subr.bf16.mxu0 %v608_v55  ;;  %v78_v15 = vld [vmem:[%s1081_s1 + $0x1e8] sm:$0xff]  ;;  %v646_v17 = vpack.c.bf16 %v60_v9, %v59_v8  ;;  %v15_v18 = vld [vmem:[%s1080_s0] sm:$0xff]  ;;  %v47_v27 = vld [vmem:[%s1081_s1 + $0xf0] sm:$0xff] }
  0x13   :  { %639 = vmatpush3.bf16.msra.mxu1 %v638_v54  ;;  %v29_v20 = vld [vmem:[%s1081_s1 + $0x60] sm:$0xff]  ;;  %v30_v21 = vld [vmem:[%s1081_s1 + $0x68] sm:$0xff]  ;;  %v131_v23 = vrot.slane %v15_v18, %v895_v10  ;;  %v124_v24 = vcombine.high %v15_v18, %v15_v18  ;;  %v648_v25 = vpack.c.bf16 %v78_v15, %v77_v14  ;;  %v48_v28 = vld [vmem:[%s1081_s1 + $0xf8] sm:$0xff] }
  0x14   :  { %641 = vmatprep.subr.bf16.mxu1 %v640_v61  ;;  %v61_v22 = vld [vmem:[%s1081_s1 + $0x160] sm:$0xff]  ;;  %v62_v26 = vld [vmem:[%s1081_s1 + $0x168] sm:$0xff]  ;;  %v79_v29 = vld [vmem:[%s1081_s1 + $0x1f0] sm:$0xff]  ;;  %v618_v33 = vpack.c.bf16 %v30_v21, %v29_v20  ;;  %v620_v35 = vpack.c.bf16 %v48_v28, %v47_v27 }
  0x15   :  { %611 = vmatpush3.bf16.msra.mxu0 %v610_v3  ;;  %v80_v30 = vld [vmem:[%s1081_s1 + $0x1f8] sm:$0xff]  ;;  %v139_v31 = vcombine.high %v131_v23, %v131_v23  ;;  %v138_v32 = vrot.slane %v124_v24, %v895_v10  ;;  %v650_v34 = vpack.c.bf16 %v62_v26, %v61_v22  ;;  %v31_v36 = vld [vmem:[%s1081_s1 + $0x70] sm:$0xff]  ;;  %v97_v42 = vld [vmem:[%s1081_s1 + $0x280] sm:$0xff] }
  0x16   :  { %613 = vmatprep.subr.bf16.mxu0 %v612_v6  ;;  %v32_v37 = vld [vmem:[%s1081_s1 + $0x78] sm:$0xff]  ;;  %v63_v38 = vld [vmem:[%s1081_s1 + $0x170] sm:$0xff]  ;;  %v652_v40 = vpack.c.bf16 %v80_v30, %v79_v29  ;;  %v98_v43 = vld [vmem:[%s1081_s1 + $0x288] sm:$0xff] }
  0x17   :  { %643 = vmatpush3.bf16.msra.mxu1 %v642_v5  ;;  %v140_v39 = vcombine.high %v138_v32, %v138_v32  ;;  %230 = vmatprep.mubr.f32.mxu0 %v139_v31  ;;  %v64_v41 = vld [vmem:[%s1081_s1 + $0x178] sm:$0xff]  ;;  %v622_v44 = vpack.c.bf16 %v32_v37, %v31_v36  ;;  %v656_v46 = vpack.c.bf16 %v98_v43, %v97_v42  ;;  %v81_v47 = vld [vmem:[%s1081_s1 + $0x200] sm:$0xff]  ;;  %v82_v48 = vld [vmem:[%s1081_s1 + $0x208] sm:$0xff] }
  0x18   :  { %645 = vmatprep.subr.bf16.mxu1 %v644_v11  ;;  %v654_v45 = vpack.c.bf16 %v64_v41, %v63_v38  ;;  %v99_v49 = vld [vmem:[%s1081_s1 + $0x290] sm:$0xff]  ;;  %v100_v50 = vld [vmem:[%s1081_s1 + $0x298] sm:$0xff]  ;;  %v658_v51 = vpack.c.bf16 %v82_v48, %v81_v47  ;;  %v16_v53 = vld [vmem:[%s1080_s0 + $0x8] sm:$0x3f] }
  0x19   :  { %615 = vmatpush3.bf16.msra.mxu0 %v614_v16  ;;  %300 = vmatprep.mubr.f32.mxu1 %v140_v39  ;;  %v83_v52 = vld [vmem:[%s1081_s1 + $0x210] sm:$0xff]  ;;  %v113_v54 = vld [vmem:[%s1081_s1 + $0x300] sm:$0xff]  ;;  %v660_v55 = vpack.c.bf16 %v100_v50, %v99_v49  ;;  %v84_v56 = vld [vmem:[%s1081_s1 + $0x218] sm:$0xff]  ;;  %v141_v57 = vcombine.high %v16_v53, %v16_v53  ;;  %v981_v58 = vrot.slane %v16_v53, %v895_v10 }
  0x1a   :  { %617 = vmatprep.subr.bf16.mxu0 %v616_v19  ;;  %v114_v59 = vld [vmem:[%s1081_s1 + $0x308] sm:$0xff] }
  0x1b   :  { %647 = vmatpush3.bf16.msra.mxu1 %v646_v17 }
  0x1c   :  { %649 = vmatprep.subr.bf16.mxu1 %v648_v25 }
  0x1d   :  { %619 = vmatpush3.bf16.msra.mxu0 %v618_v33 }
  0x1e   :  { %621 = vmatprep.subr.bf16.mxu0 %v620_v35 }
  0x1f   :  { %651 = vmatpush3.bf16.msra.mxu1 %v650_v34 }
  0x20   :  { %653 = vmatprep.subr.bf16.mxu1 %v652_v40 }
  0x21   :  { %623 = vmatpush3.bf16.msra.mxu0 %v622_v44 }
  0x22   :  { %657 = vmatprep.subr.bf16.mxu0 %v656_v46 }
  0x23   :  { %655 = vmatpush3.bf16.msra.mxu1 %v654_v45 }
  0x24   :  { %8 = vsyncpa [#allocation3], 0  ;;  %v101_v60 = vld [vmem:[%s1081_s1 + $0x2a0] sm:$0xff]  ;;  %v102_v61 = vld [vmem:[%s1081_s1 + $0x2a8] sm:$0xff]  ;;  %v727_v62 = vmov 0.0|0.0   ;;  %v689_v63 = vpack.c.bf16 %v114_v59, %v113_v54  ;;  %231 = vmatmul.mubr.f32.vlgmr.msra.gmra.mrb[0].mxu0 %v131_v23  ;;  %v156_v0 = vcombine.high %v981_v58, %v981_v58  ;;  %v662_v1 = vpack.c.bf16 %v84_v56, %v83_v52 }
  0x25   :  { %688 = vmatprep.subr.bf16.mxu1 %v727_v62  ;;  %659 = vmatpush3.bf16.msra.mxu0 %v658_v51  ;;  %v664_v2 = vpack.c.bf16 %v102_v61, %v101_v60  ;;  %v85_v3 = vld [vmem:[%s1081_s1 + $0x220] sm:$0xff]  ;;  %v86_v4 = vld [vmem:[%s1081_s1 + $0x228] sm:$0xff]  ;;  %v155_v5 = vrot.slane %v141_v57, %v895_v10  ;;  %v103_v6 = vld [vmem:[%s1081_s1 + $0x2b0] sm:$0xff]  ;;  %vm728_vm0 = vmmov 0   ;;  %v729_v8 = vmov 0.0  }
  0x26   :  { %301 = vmatmul.mubr.f32.vlgmr.msra.gmra.mrb[0].mxu1 %v138_v32  ;;  %661 = vmatprep.subr.bf16.mxu0 %v660_v55  ;;  %v104_v7 = vld [vmem:[%s1081_s1 + $0x2b8] sm:$0xff]  ;;  %vm163_vm1 = vcmask 130048   ;;  %v666_v9 = vpack.c.bf16 %v86_v4, %v85_v3  ;;  %v87_v10 = vld [vmem:[%s1081_s1 + $0x230] sm:$0xff]  ;;  %v105_v13 = vld [vmem:[%s1081_s1 + $0x2c0] sm:$0xff]  ;;  %vm447_vm2 = vcmask 156672  }
  0x27   :  { %370 = vmatprep.mubr.f32.mxu0 %v156_v0  ;;  %690 = vmatpush3.bf16.msra.mxu1 %v689_v63  ;;  %v668_v11 = vpack.c.bf16 %v104_v7, %v103_v6  ;;  %v88_v12 = vld [vmem:[%s1081_s1 + $0x238] sm:$0xff]  ;;  %v106_v14 = vld [vmem:[%s1081_s1 + $0x2c8] sm:$0xff]  ;;  %v89_v17 = vld [vmem:[%s1081_s1 + $0x240] sm:$0xff] }
  0x28   :  { %589 = vmatprep.mubr.msk.f32.mxu1 %vm728_vm0, %v729_v8  ;;  %v670_v15 = vpack.c.bf16 %v88_v12, %v87_v10  ;;  %v672_v16 = vpack.c.bf16 %v106_v14, %v105_v13  ;;  %v90_v18 = vld [vmem:[%s1081_s1 + $0x248] sm:$0xff]  ;;  %v107_v19 = vld [vmem:[%s1081_s1 + $0x2d0] sm:$0xff]  ;;  %v108_v20 = vld [vmem:[%s1081_s1 + $0x2d8] sm:$0xff] }
  0x29   :  { %663 = vmatpush3.bf16.msra.mxu0 %v662_v1  ;;  %v674_v21 = vpack.c.bf16 %v90_v18, %v89_v17  ;;  %v676_v22 = vpack.c.bf16 %v108_v20, %v107_v19  ;;  %v91_v23 = vld [vmem:[%s1081_s1 + $0x250] sm:$0xff]  ;;  %v92_v24 = vld [vmem:[%s1081_s1 + $0x258] sm:$0xff]  ;;  %v109_v25 = vld [vmem:[%s1081_s1 + $0x2e0] sm:$0xff] }
  0x2a   :  { %665 = vmatprep.subr.bf16.mxu0 %v664_v2  ;;  %590 = vmatmul.mubr.msk.f32.vlgmr.msra.gmra.mrb[2].mxu1 %vm163_vm1, %v155_v5  ;;  %v110_v26 = vld [vmem:[%s1081_s1 + $0x2e8] sm:$0xff]  ;;  %v678_v27 = vpack.c.bf16 %v92_v24, %v91_v23  ;;  %v93_v29 = vld [vmem:[%s1081_s1 + $0x260] sm:$0xff]  ;;  %v111_v31 = vld [vmem:[%s1081_s1 + $0x2f0] sm:$0xff] }
  0x2b   :  { %v680_v28 = vpack.c.bf16 %v110_v26, %v109_v25  ;;  %v94_v30 = vld [vmem:[%s1081_s1 + $0x268] sm:$0xff]  ;;  %v112_v32 = vld [vmem:[%s1081_s1 + $0x2f8] sm:$0xff]  ;;  %v95_v35 = vld [vmem:[%s1081_s1 + $0x270] sm:$0xff] }
  0x2c   :  { %v682_v33 = vpack.c.bf16 %v94_v30, %v93_v29  ;;  %v684_v34 = vpack.c.bf16 %v112_v32, %v111_v31  ;;  %v96_v36 = vld [vmem:[%s1081_s1 + $0x278] sm:$0xff]  ;;  %v475_v39 = vld [vmem:[%s1082_s2] ss:$0 sm:$0xff]  ;;  %s730_s1 = smov [#allocation2]  }
  0x2d   :  { %667 = vmatpush3.bf16.msra.mxu0 %v666_v9  ;;  %v686_v37 = vpack.c.bf16 %v96_v36, %v95_v35  ;;  %s467_s2 = sshll.u32 %s730_s1, 4  ;;  %s468_s2 = int_to_ptr.vmem [resolvable:$true] %s467_s2 }
  0x2e   :  { %669 = vmatprep.subr.bf16.mxu0 %v668_v11  ;;  %s702_s23 = scalar_lea.vmem %s468_s2, 32  ;;  %p707_p1 = scmp.lt.s32.totalorder %s468_s2, %s468_s2 }
  0x2f   :  { %p703_p0 = scmp.ne.s32.totalorder %s468_s2, %s702_s23  ;;  %p708_p2 = scmp.lt.s32.totalorder %s702_s23, %s702_s23 }
  0x31   :  { %671 = vmatpush3.bf16.msra.mxu0 %v670_v15  ;;  %p709_p3 = por %p708_p2, %p707_p1 }
  0x32   :  { %673 = vmatprep.subr.bf16.mxu0 %v672_v16 }
  0x33   :  { %p710_p4 = pnand %p709_p3, %p703_p0 }
  0x35   :  { %675 = vmatpush3.bf16.msra.mxu0 %v674_v21 }
  0x36   :  { %677 = vmatprep.subr.bf16.mxu0 %v676_v22 }
  0x39   :  { %679 = vmatpush3.bf16.msra.mxu0 %v678_v27 }
  0x3a   :  { %681 = vmatprep.subr.bf16.mxu0 %v680_v28 }
  0x3d   :  { %683 = vmatpush3.bf16.msra.mxu0 %v682_v33 }
  0x3e   :  { %685 = vmatprep.subr.bf16.mxu0 %v684_v34 }
  0x41   :  { %687 = vmatpush3.bf16.msra.mxu0 %v686_v37 }
  0x44   :  { %371 = vmatmul.mubr.f32.vlgmr.msra.gmra.mrb[2].mxu0 %v981_v58 }
  0xf7   :  { %v509_v38 = vpop.f32.mrb[0].mxu0 }
  0xf8   :  { %v510_v40 = vpop.f32.mrb[1].mxu0 }
  0xf9   :  { %v544_v41 = vpop.f32.mrb[0].mxu1  ;;  %v511_v42 = vadd.f32 %v510_v40, %v509_v38 }
  0xfa   :  { %v545_v43 = vpop.f32.mrb[1].mxu1 }
  0xfb   :  { %v546_v44 = vadd.f32 %v545_v43, %v544_v41  ;;  %v233_v45 = vadd.f32 %v511_v42, %v475_v39 }
  0xfd   :  { %v303_v46 = vadd.f32 %v546_v44, %v233_v45  ;;  %v442_v47 = vpop.f32.mrb[2].mxu1 }
  0xfe   :  { %v591_v48 = vpop.f32.mrb[3].mxu1 }
 0x117   :  { %v579_v49 = vpop.f32.mrb[2].mxu0 }
 0x118   :  { %v580_v50 = vpop.f32.mrb[3].mxu0 }
 0x119   :  { %v581_v51 = vadd.f32 %v580_v50, %v579_v49 }
 0x11b   :  { %v373_v52 = vadd.f32 %v581_v51, %v303_v46 }
 0x11d   :  { %v443_v53 = vadd.f32 %v442_v47, %v373_v52 }
 0x11f   :  { %v446_v54 = vmax.f32 %v443_v53, 0.0 }
 0x121   :  { %v448_v55 = vsel %vm447_vm2, %v446_v54, -inf }
 0x122   :  { %449 = vmax.xlane.f32.xlu0 %v448_v55 }
 0x1af   :  { %v450_v56 = vpop.xlane.xlu0 %449 }
 0x1b0   :  { %v451_v57 = vsub.f32 %v446_v54, %v450_v56 }
 0x1b2   :  { %v452_v58 = vmul.f32 1.442695, %v451_v57 }
 0x1b4   :  { %698 = vpow2.f32 %v452_v58 }
 0x1be   :  { %v699_v59 = vpop.eup %698 }
 0x1bf   :  { %v454_v60 = vsel %vm447_vm2, %v699_v59, 0.0 }
 0x1c0   :  { %455 = vadd.xlane.f32.xlu0 %v454_v60 }
 0x24d   :  { %v456_v61 = vpop.xlane.xlu0 %455 }
 0x24e   :  { %700 = vlog2.f32 %v456_v61 }
 0x258   :  { %v701_v62 = vpop.eup %700 }
 0x259   :  { %v458_v63 = vmul.f32 0.6931472, %v701_v62 }
 0x25b   :  { %v459_v0 = vsub.f32 %v451_v57, %v458_v63 }
 0x25d   :  { %460 = vst.msk [vmem:[#allocation2] sm:$0x3] %vm447_vm2, %v459_v0 }
 0x25e   :  { %713 = shalt.err (!%p710_p4)
}
 0x25f   :  { %s714_s26 = scalar_lea.hbm %s1083_s3, 32 }
 0x260   :  { %p715_p5 = scmp.ne.s32.totalorder %s1083_s3, %s714_s26  ;;  %p718_p6 = scmp.lt.u32.totalorder %s714_s26, %s1083_s3 }
 0x262   :  { %p720_p7 = pnand %p718_p6, %p715_p5 }
 0x264   :  { %723 = shalt.err (!%p720_p7)
}
 0x265   :  { %470 = dma.vmem_to_hbm [thread:$0]  %s468_s2, 32, %s1083_s3, [#allocation3]  }
 0x266   :  { %724 = dma.done.wait [#allocation3], 32  }
 0x267   :  { %725 = vsyncadd [#allocation3], 4294967264 }
 0x268   :  { %474 = vsyncpa [#allocation3], 1 }

</bundles_post_ra>
